<compile_context>
chip_gen: v6e
topology: v6e:2x2x1
jax: 0.10.0
libtpu: 0.0.40
codegen_flags: <defaults>
</compile_context>

<pallas_src>
import jax
import jax.numpy as jnp
from jax.experimental import pallas as pl
from jax.experimental.pallas import tpu as pltpu


def _round_up(x, m):
    return ((x + m - 1) // m) * m


# --------------------------------------------------------------------------
# Kernels
# --------------------------------------------------------------------------
def _triplet_kernel_stacked(a_ref, p_ref, n_ref, w1_ref, b1_ref, w2_ref,
                            b2_ref, oa_ref, op_ref, on_ref, x_scr):
    """Small-tile path: stack a/p/n along M so each layer is one MXU matmul.

    Only used when tm is a multiple of 16, so every sublane offset below
    (0, tm, 2*tm) is tile-aligned for both bf16 and f32.
    """
    tm = a_ref.shape[0]
    rows = 3 * tm
    x_scr[0:tm, :] = a_ref[...]
    x_scr[tm:2 * tm, :] = p_ref[...]
    x_scr[2 * tm:rows, :] = n_ref[...]

    w1 = w1_ref[...]
    w2 = w2_ref[...]
    b1b = jnp.broadcast_to(b1_ref[...], (rows, w1.shape[1]))   # hoisted once
    b2b = jnp.broadcast_to(b2_ref[...], (rows, w2.shape[1]))

    h = jnp.dot(x_scr[...], w1, preferred_element_type=jnp.float32) + b1b
    h = jnp.maximum(h, 0.0).astype(w2.dtype)
    o = (jnp.dot(h, w2, preferred_element_type=jnp.float32) + b2b)
    o = o.astype(oa_ref.dtype)

    oa_ref[...] = o[0:tm, :]
    op_ref[...] = o[tm:2 * tm, :]
    on_ref[...] = o[2 * tm:rows, :]


def _triplet_kernel_permember(a_ref, p_ref, n_ref, w1_ref, b1_ref, w2_ref,
                              b2_ref, oa_ref, op_ref, on_ref):
    """Large-tile (or tiny full-block) path: M already fills the MXU."""
    tm = a_ref.shape[0]
    w1 = w1_ref[...]
    w2 = w2_ref[...]
    b1b = jnp.broadcast_to(b1_ref[...], (tm, w1.shape[1]))     # hoisted once
    b2b = jnp.broadcast_to(b2_ref[...], (tm, w2.shape[1]))
    for x_ref, o_ref in ((a_ref, oa_ref), (p_ref, op_ref), (n_ref, on_ref)):
        h = jnp.dot(x_ref[...], w1, preferred_element_type=jnp.float32) + b1b
        h = jnp.maximum(h, 0.0).astype(w2.dtype)
        o = jnp.dot(h, w2, preferred_element_type=jnp.float32) + b2b
        o_ref[...] = o.astype(o_ref.dtype)


# --------------------------------------------------------------------------
# Tiling plan (generation-aware)
# --------------------------------------------------------------------------
def _vmem_capacity_bytes():
    try:
        return int(pltpu.get_tpu_info().vmem_capacity_bytes)
    except Exception:
        return 64 * 1024 * 1024          # conservative (v7x-sized) fallback


def _plan_tiling(batch, in_dim, hp, embed):
    """Pick (row_tile, use_stacked_path) from the real VMEM budget."""
    vmem_cap = _vmem_capacity_bytes()
    budget = int(0.6 * vmem_cap)         # headroom for compiler scratch/spills

    # Double-buffered weights/biases (constant index map still gets 2 bufs).
    weight_bytes = 2 * ((in_dim * hp + hp * embed) * 2 + (hp + embed) * 4)
    # Double-buffered bf16 activation-in + f32 embedding-out blocks, per row.
    per_row = 2 * (3 * in_dim * 2 + 3 * embed * 4)

    if batch < 16:
        return batch, False              # one full block; tiny demo batches

    # Keep >= 2 grid steps once batch >= 32 so the "parallel" row axis can
    # shard across v7x's two TensorCores (no-op on v5e/v6e).
    cap = max(16, _round_up(-(-batch // 2), 16))
    tm = 16
    for cand in (1024, 512, 256, 128, 64, 32, 16):
        if cand > cap:
            continue
        stacked = cand < 256
        rows = 3 * cand if stacked else cand
        extra = (3 * cand * in_dim * 2 if stacked else 0) + rows * hp * 4
        if cand * per_row + weight_bytes + extra <= budget:
            tm = cand
            break
    return tm, tm < 256


# --------------------------------------------------------------------------
# Wrapper
# --------------------------------------------------------------------------
def triplet_net_forward(a, p, n, params):
    """TripletNet.forward: returns (embedded_a, embedded_p, embedded_n)."""
    w1, b1, w2, b2 = params
    in_dim, hidden = w1.shape
    embed = w2.shape[1]
    batch = a.shape[0]

    # bf16 activations into the kernel (halves the dominant HBM read term);
    # flatten is a free reshape and the cast fuses with upstream producers.
    flat = lambda t: t.reshape(t.shape[0], -1).astype(jnp.bfloat16)
    af, pf, nf = flat(a), flat(p), flat(n)

    # Pad only the hidden dim to a lane multiple (zero cols of W1 give
    # relu(0+0)=0 and zero rows of W2 contribute nothing).  The output dim is
    # left unpadded so the kernel writes [batch, embed] directly -> no
    # wrapper-side output slices.
    hp = _round_up(hidden, 128)
    w1p = jnp.zeros((in_dim, hp), jnp.bfloat16).at[:, :hidden].set(
        w1.astype(jnp.bfloat16))
    b1p = jnp.zeros((1, hp), jnp.float32).at[:, :hidden].set(
        b1.reshape(1, -1).astype(jnp.float32))
    w2p = jnp.zeros((hp, embed), jnp.bfloat16).at[:hidden, :].set(
        w2.astype(jnp.bfloat16))
    b2p = b2.reshape(1, -1).astype(jnp.float32)

    tm, stacked = _plan_tiling(batch, in_dim, hp, embed)
    batch_p = _round_up(batch, tm)
    if batch_p != batch:                 # awkward batch: pad rows, keep tm big
        pad = lambda t: jnp.zeros((batch_p, in_dim), t.dtype).at[:batch].set(t)
        af, pf, nf = pad(af), pad(pf), pad(nf)
    grid = (batch_p // tm,)

    act_spec = pl.BlockSpec((tm, in_dim), lambda i: (i, 0))
    out_spec = pl.BlockSpec((tm, embed), lambda i: (i, 0))
    const = lambda shape: pl.BlockSpec(shape, lambda i: (0, 0))

    kernel = _triplet_kernel_stacked if stacked else _triplet_kernel_permember
    scratch = ([pltpu.VMEM((3 * tm, in_dim), jnp.bfloat16)] if stacked else [])

    vmem_cap = _vmem_capacity_bytes()
    block_bytes = (2 * tm * (3 * in_dim * 2 + 3 * embed * 4)
                   + 2 * ((in_dim * hp + hp * embed) * 2 + (hp + embed) * 4)
                   + (3 * tm * in_dim * 2 if stacked else 0)
                   + (3 * tm if stacked else tm) * hp * 4)
    vmem_limit = int(min(0.9 * vmem_cap,
                         max(2 * block_bytes, 32 * 1024 * 1024)))

    flops = 2 * 3 * batch_p * (in_dim * hp + hp * embed)
    bytes_accessed = (3 * batch_p * in_dim * 2
                      + (in_dim * hp + hp * embed) * 2 + (hp + embed) * 4
                      + 3 * batch_p * embed * 4)

    oa, op_, on = pl.pallas_call(
        kernel,
        out_shape=(jax.ShapeDtypeStruct((batch_p, embed), jnp.float32),) * 3,
        grid=grid,
        in_specs=[act_spec, act_spec, act_spec,
                  const((in_dim, hp)), const((1, hp)),
                  const((hp, embed)), const((1, embed))],
        out_specs=[out_spec, out_spec, out_spec],
        scratch_shapes=scratch,
        compiler_params=pltpu.CompilerParams(
            dimension_semantics=("parallel",),
            vmem_limit_bytes=vmem_limit),
        cost_estimate=pl.CostEstimate(flops=flops, transcendentals=0,
                                      bytes_accessed=bytes_accessed),
    )(af, pf, nf, w1p, b1p, w2p, b2p)

    if batch_p != batch:
        oa, op_, on = oa[:batch], op_[:batch], on[:batch]
    return oa, op_, on


def init_params(key, in_dim, hidden_dim, embed_dim):
    k1, k2 = jax.random.split(key)
    w1 = jax.random.normal(k1, (in_dim, hidden_dim), jnp.float32) * 0.02
    b1 = jnp.zeros((1, hidden_dim), jnp.float32)
    w2 = jax.random.normal(k2, (hidden_dim, embed_dim), jnp.float32) * 0.02
    b2 = jnp.zeros((1, embed_dim), jnp.float32)
    return w1, b1, w2, b2


if __name__ == "__main__":
    key = jax.random.PRNGKey(0)
    ka, kp, kn, kparam = jax.random.split(key, 4)

    # Small NCHW inputs: batch=2, channels=4, spatial=16x16.
    B, C, H, W = 2, 4, 16, 16
    a = jax.random.normal(ka, (B, C, H, W), jnp.float32)
    p = jax.random.normal(kp, (B, C, H, W), jnp.float32)
    n = jax.random.normal(kn, (B, C, H, W), jnp.float32)

    in_dim = C * H * W          # 1024
    hidden_dim = 128
    embed_dim = 64
    params = init_params(kparam, in_dim, hidden_dim, embed_dim)

    fwd = jax.jit(triplet_net_forward)
    ea, ep_, en = fwd(a, p, n, params)
    jax.block_until_ready((ea, ep_, en))

    # Reference: same bf16-operand / f32-accumulate math in plain JAX.
    def ref_embed(x):
        w1, b1, w2, b2 = params
        xf = x.reshape(x.shape[0], -1).astype(jnp.bfloat16)
        h = jnp.dot(xf, w1.astype(jnp.bfloat16),
                    preferred_element_type=jnp.float32) + b1
        h = jnp.maximum(h, 0.0).astype(jnp.bfloat16)
        return jnp.dot(h, w2.astype(jnp.bfloat16),
                       preferred_element_type=jnp.float32) + b2

    for out, inp in ((ea, a), (ep_, p), (en, n)):
        assert out.shape == (B, embed_dim)
        assert jnp.allclose(out, ref_embed(inp), atol=2e-2, rtol=2e-2)

    # Also exercise the stacked-M / multi-step-grid path (batch >= 32).
    B2 = 32
    k2a, k2p, k2n = jax.random.split(jax.random.PRNGKey(1), 3)
    a2 = jax.random.normal(k2a, (B2, C, H, W), jnp.float32)
    p2 = jax.random.normal(k2p, (B2, C, H, W), jnp.float32)
    n2 = jax.random.normal(k2n, (B2, C, H, W), jnp.float32)
    ea2, ep2, en2 = fwd(a2, p2, n2, params)
    jax.block_until_ready((ea2, ep2, en2))
    for out, inp in ((ea2, a2), (ep2, p2), (en2, n2)):
        assert out.shape == (B2, embed_dim)
        assert jnp.allclose(out, ref_embed(inp), atol=2e-2, rtol=2e-2)

    print("KERNEL_OK")
</pallas_src>

<mosaic_0001>
module attributes {stable_mosaic.version = 11 : i64} {
  func.func @_triplet_kernel_permember(%arg0: i32, %arg1: memref<2x1024xbf16, #tpu.memory_space<vmem>>, %arg2: memref<2x1024xbf16, #tpu.memory_space<vmem>>, %arg3: memref<2x1024xbf16, #tpu.memory_space<vmem>>, %arg4: memref<1024x128xbf16, #tpu.memory_space<vmem>>, %arg5: memref<1x128xf32, #tpu.memory_space<vmem>>, %arg6: memref<128x64xbf16, #tpu.memory_space<vmem>>, %arg7: memref<1x64xf32, #tpu.memory_space<vmem>>, %arg8: memref<2x64xf32, #tpu.memory_space<vmem>>, %arg9: memref<2x64xf32, #tpu.memory_space<vmem>>, %arg10: memref<2x64xf32, #tpu.memory_space<vmem>>) attributes {dimension_semantics = [#tpu.dimension_semantics<parallel>], iteration_bounds = array<i64: 1>, scalar_prefetch = 0 : i64, scratch_operands = 0 : i64, tpu.core_type = #tpu.core_type<tc>, window_params = [{transform_indices = @transform_0, window_bounds = array<i64: 2, 1024>}, {transform_indices = @transform_1, window_bounds = array<i64: 2, 1024>}, {transform_indices = @transform_2, window_bounds = array<i64: 2, 1024>}, {pipeline_mode = #tpu.pipeline_mode<synchronous>, transform_indices = @transform_3, window_bounds = array<i64: 1024, 128>}, {pipeline_mode = #tpu.pipeline_mode<synchronous>, transform_indices = @transform_4, window_bounds = array<i64: 1, 128>}, {pipeline_mode = #tpu.pipeline_mode<synchronous>, transform_indices = @transform_5, window_bounds = array<i64: 128, 64>}, {pipeline_mode = #tpu.pipeline_mode<synchronous>, transform_indices = @transform_6, window_bounds = array<i64: 1, 64>}, {transform_indices = @transform_7, window_bounds = array<i64: 2, 64>}, {transform_indices = @transform_8, window_bounds = array<i64: 2, 64>}, {transform_indices = @transform_9, window_bounds = array<i64: 2, 64>}]} {
    %c0 = arith.constant 0 : index
    %c0_0 = arith.constant 0 : index
    %0 = vector.load %arg4[%c0, %c0_0] : memref<1024x128xbf16, #tpu.memory_space<vmem>>, vector<1024x128xbf16>
    %c0_1 = arith.constant 0 : index
    %c0_2 = arith.constant 0 : index
    %1 = vector.load %arg6[%c0_1, %c0_2] : memref<128x64xbf16, #tpu.memory_space<vmem>>, vector<128x64xbf16>
    %c0_3 = arith.constant 0 : index
    %c0_4 = arith.constant 0 : index
    %2 = vector.load %arg5[%c0_3, %c0_4] : memref<1x128xf32, #tpu.memory_space<vmem>>, vector<1x128xf32>
    %3 = vector.shape_cast %2 : vector<1x128xf32> to vector<1x128xf32>
    %4 = vector.broadcast %3 : vector<1x128xf32> to vector<2x128xf32>
    %c0_5 = arith.constant 0 : index
    %c0_6 = arith.constant 0 : index
    %5 = vector.load %arg7[%c0_5, %c0_6] : memref<1x64xf32, #tpu.memory_space<vmem>>, vector<1x64xf32>
    %6 = vector.shape_cast %5 : vector<1x64xf32> to vector<1x64xf32>
    %7 = vector.broadcast %6 : vector<1x64xf32> to vector<2x64xf32>
    %c0_7 = arith.constant 0 : index
    %c0_8 = arith.constant 0 : index
    %8 = vector.load %arg1[%c0_7, %c0_8] : memref<2x1024xbf16, #tpu.memory_space<vmem>>, vector<2x1024xbf16>
    %cst = arith.constant dense<0.000000e+00> : vector<2x128xf32>
    %9 = tpu.matmul %8, %0, %cst {dimension_numbers = #tpu.dot_dimension_numbers<[1], [0], [0], [1], [0, 0, 1, 1], [], []>} : vector<2x1024xbf16>, vector<1024x128xbf16>, vector<2x128xf32> -> vector<2x128xf32>
    %10 = arith.addf %9, %4 : vector<2x128xf32>
    %cst_9 = arith.constant 0.000000e+00 : f32
    %11 = vector.broadcast %cst_9 : f32 to vector<2x128xf32>
    %12 = arith.maximumf %10, %11 : vector<2x128xf32>
    %13 = arith.truncf %12 : vector<2x128xf32> to vector<2x128xbf16>
    %cst_10 = arith.constant dense<0.000000e+00> : vector<2x64xf32>
    %14 = tpu.matmul %13, %1, %cst_10 {dimension_numbers = #tpu.dot_dimension_numbers<[1], [0], [0], [1], [0, 0, 1, 1], [], []>} : vector<2x128xbf16>, vector<128x64xbf16>, vector<2x64xf32> -> vector<2x64xf32>
    %15 = arith.addf %14, %7 : vector<2x64xf32>
    %c0_11 = arith.constant 0 : index
    %c0_12 = arith.constant 0 : index
    %16 = vector.load %arg8[%c0_11, %c0_12] : memref<2x64xf32, #tpu.memory_space<vmem>>, vector<2x64xf32>
    tpu.vector_store %arg8[%c0_11, %c0_12], %15 {strides = array<i32>} : memref<2x64xf32, #tpu.memory_space<vmem>>, vector<2x64xf32>,
    %c0_13 = arith.constant 0 : index
    %c0_14 = arith.constant 0 : index
    %17 = vector.load %arg2[%c0_13, %c0_14] : memref<2x1024xbf16, #tpu.memory_space<vmem>>, vector<2x1024xbf16>
    %cst_15 = arith.constant dense<0.000000e+00> : vector<2x128xf32>
    %18 = tpu.matmul %17, %0, %cst_15 {dimension_numbers = #tpu.dot_dimension_numbers<[1], [0], [0], [1], [0, 0, 1, 1], [], []>} : vector<2x1024xbf16>, vector<1024x128xbf16>, vector<2x128xf32> -> vector<2x128xf32>
    %19 = arith.addf %18, %4 : vector<2x128xf32>
    %cst_16 = arith.constant 0.000000e+00 : f32
    %20 = vector.broadcast %cst_16 : f32 to vector<2x128xf32>
    %21 = arith.maximumf %19, %20 : vector<2x128xf32>
    %22 = arith.truncf %21 : vector<2x128xf32> to vector<2x128xbf16>
    %cst_17 = arith.constant dense<0.000000e+00> : vector<2x64xf32>
    %23 = tpu.matmul %22, %1, %cst_17 {dimension_numbers = #tpu.dot_dimension_numbers<[1], [0], [0], [1], [0, 0, 1, 1], [], []>} : vector<2x128xbf16>, vector<128x64xbf16>, vector<2x64xf32> -> vector<2x64xf32>
    %24 = arith.addf %23, %7 : vector<2x64xf32>
    %c0_18 = arith.constant 0 : index
    %c0_19 = arith.constant 0 : index
    %25 = vector.load %arg9[%c0_18, %c0_19] : memref<2x64xf32, #tpu.memory_space<vmem>>, vector<2x64xf32>
    tpu.vector_store %arg9[%c0_18, %c0_19], %24 {strides = array<i32>} : memref<2x64xf32, #tpu.memory_space<vmem>>, vector<2x64xf32>,
    %c0_20 = arith.constant 0 : index
    %c0_21 = arith.constant 0 : index
    %26 = vector.load %arg3[%c0_20, %c0_21] : memref<2x1024xbf16, #tpu.memory_space<vmem>>, vector<2x1024xbf16>
    %cst_22 = arith.constant dense<0.000000e+00> : vector<2x128xf32>
    %27 = tpu.matmul %26, %0, %cst_22 {dimension_numbers = #tpu.dot_dimension_numbers<[1], [0], [0], [1], [0, 0, 1, 1], [], []>} : vector<2x1024xbf16>, vector<1024x128xbf16>, vector<2x128xf32> -> vector<2x128xf32>
    %28 = arith.addf %27, %4 : vector<2x128xf32>
    %cst_23 = arith.constant 0.000000e+00 : f32
    %29 = vector.broadcast %cst_23 : f32 to vector<2x128xf32>
    %30 = arith.maximumf %28, %29 : vector<2x128xf32>
    %31 = arith.truncf %30 : vector<2x128xf32> to vector<2x128xbf16>
    %cst_24 = arith.constant dense<0.000000e+00> : vector<2x64xf32>
    %32 = tpu.matmul %31, %1, %cst_24 {dimension_numbers = #tpu.dot_dimension_numbers<[1], [0], [0], [1], [0, 0, 1, 1], [], []>} : vector<2x128xbf16>, vector<128x64xbf16>, vector<2x64xf32> -> vector<2x64xf32>
    %33 = arith.addf %32, %7 : vector<2x64xf32>
    %c0_25 = arith.constant 0 : index
    %c0_26 = arith.constant 0 : index
    %34 = vector.load %arg10[%c0_25, %c0_26] : memref<2x64xf32, #tpu.memory_space<vmem>>, vector<2x64xf32>
    tpu.vector_store %arg10[%c0_25, %c0_26], %33 {strides = array<i32>} : memref<2x64xf32, #tpu.memory_space<vmem>>, vector<2x64xf32>,
    return
  }
  func.func @transform_0(%arg0: i32) -> (i32, i32) {
    %c0_i32 = arith.constant 0 : i32
    %c0_i32_0 = arith.constant 0 : i32
    return %arg0, %c0_i32 : i32, i32
  }
  func.func @transform_1(%arg0: i32) -> (i32, i32) {
    %c0_i32 = arith.constant 0 : i32
    %c0_i32_0 = arith.constant 0 : i32
    return %arg0, %c0_i32 : i32, i32
  }
  func.func @transform_2(%arg0: i32) -> (i32, i32) {
    %c0_i32 = arith.constant 0 : i32
    %c0_i32_0 = arith.constant 0 : i32
    return %arg0, %c0_i32 : i32, i32
  }
  func.func @transform_3(%arg0: i32) -> (i32, i32) {
    %c0_i32 = arith.constant 0 : i32
    %c0_i32_0 = arith.constant 0 : i32
    %c0_i32_1 = arith.constant 0 : i32
    return %c0_i32, %c0_i32_0 : i32, i32
  }
  func.func @transform_4(%arg0: i32) -> (i32, i32) {
    %c0_i32 = arith.constant 0 : i32
    %c0_i32_0 = arith.constant 0 : i32
    %c0_i32_1 = arith.constant 0 : i32
    return %c0_i32, %c0_i32_0 : i32, i32
  }
  func.func @transform_5(%arg0: i32) -> (i32, i32) {
    %c0_i32 = arith.constant 0 : i32
    %c0_i32_0 = arith.constant 0 : i32
    %c0_i32_1 = arith.constant 0 : i32
    return %c0_i32, %c0_i32_0 : i32, i32
  }
  func.func @transform_6(%arg0: i32) -> (i32, i32) {
    %c0_i32 = arith.constant 0 : i32
    %c0_i32_0 = arith.constant 0 : i32
    %c0_i32_1 = arith.constant 0 : i32
    return %c0_i32, %c0_i32_0 : i32, i32
  }
  func.func @transform_7(%arg0: i32) -> (i32, i32) {
    %c0_i32 = arith.constant 0 : i32
    %c0_i32_0 = arith.constant 0 : i32
    return %arg0, %c0_i32 : i32, i32
  }
  func.func @transform_8(%arg0: i32) -> (i32, i32) {
    %c0_i32 = arith.constant 0 : i32
    %c0_i32_0 = arith.constant 0 : i32
    return %arg0, %c0_i32 : i32, i32
  }
  func.func @transform_9(%arg0: i32) -> (i32, i32) {
    %c0_i32 = arith.constant 0 : i32
    %c0_i32_0 = arith.constant 0 : i32
    return %arg0, %c0_i32 : i32, i32
  }
}

</mosaic_0001>

<bundles_post_ra>
// kernel: triplet_net_forward.1
= control target key start
LH: loop header
LB: loop body
LE: loop exit
PB: predicated region body
PF: predicated region fallthrough
CT: control target
= control target key end

     0   :  { %15 = vsyncpa [#allocation3], 0  ;;  %v196_v28 = vlaneseq  ;;  %v2026_v36 = vmov 1966171168   ;;  %s2808_s0 = inlined_call_operand.vmem [shape: bf16[2,1024], index: 0, kind: input, shape index: {}]   ;;  %s2809_s1 = inlined_call_operand.vmem [shape: bf16[2,1024], index: 1, kind: input, shape index: {}]   ;;  %s2810_s2 = inlined_call_operand.vmem [shape: bf16[2,1024], index: 2, kind: input, shape index: {}]   ;;  %s2811_s3 = inlined_call_operand.vmem [shape: bf16[1024,128], index: 3, kind: input, shape index: {}]   ;;  %s2812_s4 = inlined_call_operand.vmem [shape: f32[1,128], index: 4, kind: input, shape index: {}]   ;;  %s2813_s5 = inlined_call_operand.vmem [shape: bf16[128,64], index: 5, kind: input, shape index: {}]   ;;  %s2814_s6 = inlined_call_operand.vmem [shape: f32[1,64], index: 6, kind: input, shape index: {}]   ;;  %s2815_s7 = inlined_call_operand.hbm [shape: f32[2,64], index: 7, kind: output, shape index: {0}]   ;;  %s2816_s8 = inlined_call_operand.hbm [shape: f32[2,64], index: 8, kind: output, shape index: {1}]   ;;  %s2817_s9 = inlined_call_operand.hbm [shape: f32[2,64], index: 9, kind: output, shape index: {2}]  }
   0x1   :  { %v2085_v0 = vld [vmem:[%s2811_s3 + $0x78] sm:$0xff]   ;;  %v2108_v4 = vld [vmem:[%s2811_s3 + $0x70] sm:$0xff]   ;;  %v2132_v8 = vld [vmem:[%s2811_s3 + $0x68] sm:$0xff]   ;;  %v194_v37 = vunpack.c.l.s4 %v2026_v36 }
   0x2   :  { %v2090_v1 = vld [vmem:[%s2811_s3 + $0xf8] sm:$0xff]   ;;  %1524 = vmatprep.subr.bf16.mxu0 %v2085_v0  ;;  %v2114_v5 = vld [vmem:[%s2811_s3 + $0xf0] sm:$0xff]   ;;  %v2138_v9 = vld [vmem:[%s2811_s3 + $0xe8] sm:$0xff]   ;;  %v197_v33 = vshrl.u32 %v196_v28, 7 }
   0x3   :  { %v2096_v2 = vld [vmem:[%s2811_s3 + $0x38] sm:$0xff]   ;;  %1546 = vmatprep.subr.bf16.mxu1 %v2090_v1  ;;  %v2120_v6 = vld [vmem:[%s2811_s3 + $0x30] sm:$0xff]   ;;  %v2144_v10 = vld [vmem:[%s2811_s3 + $0x28] sm:$0xff]   ;;  %v195_v40 = vunpack.c.0.s8 %v194_v37 }
   0x4   :  { %v2102_v3 = vld [vmem:[%s2811_s3 + $0xb8] sm:$0xff]   ;;  %1525 = vmatpush3.bf16.msra.mxu0 %v2096_v2  ;;  %v2126_v7 = vld [vmem:[%s2811_s3 + $0xb0] sm:$0xff]   ;;  %v2150_v11 = vld [vmem:[%s2811_s3 + $0xa8] sm:$0xff]  }
   0x5   :  { %1547 = vmatpush3.bf16.msra.mxu1 %v2102_v3  ;;  %1526 = vmatprep.subr.bf16.mxu0 %v2108_v4  ;;  %v2156_v12 = vld [vmem:[%s2811_s3 + $0x60] sm:$0xff]   ;;  %v2180_v16 = vld [vmem:[%s2811_s3 + $0x58] sm:$0xff]   ;;  %v2204_v20 = vld [vmem:[%s2811_s3 + $0x50] sm:$0xff]   ;;  %v2289_v41 = vsub.s32 %v195_v40, %v197_v33 }
   0x6   :  { %1548 = vmatprep.subr.bf16.mxu1 %v2114_v5  ;;  %2859 = vst [vmem:[#allocation9_spill] sm:$0xff] %v2156_v12  ;;  %v2162_v13 = vld [vmem:[%s2811_s3 + $0xe0] sm:$0xff]   ;;  %2861 = vst [vmem:[#allocation11_spill] sm:$0xff] %v2180_v16  ;;  %v2186_v17 = vld [vmem:[%s2811_s3 + $0xd8] sm:$0xff]  }
   0x7   :  { %v2168_v14 = vld [vmem:[%s2811_s3 + $0x20] sm:$0xff]   ;;  %v2192_v18 = vld [vmem:[%s2811_s3 + $0x18] sm:$0xff]   ;;  %2863 = vst [vmem:[#allocation13_spill] sm:$0xff] %v2204_v20  ;;  %v2210_v21 = vld [vmem:[%s2811_s3 + $0xd0] sm:$0xff]  }
   0x8   :  { %1527 = vmatpush3.bf16.msra.mxu0 %v2120_v6  ;;  %2860 = vst [vmem:[#allocation10_spill] sm:$0xff] %v2168_v14  ;;  %v2174_v15 = vld [vmem:[%s2811_s3 + $0xa0] sm:$0xff]   ;;  %2862 = vst [vmem:[#allocation12_spill] sm:$0xff] %v2192_v18  ;;  %v2198_v19 = vld [vmem:[%s2811_s3 + $0x98] sm:$0xff]  }
   0x9   :  { %1549 = vmatpush3.bf16.msra.mxu1 %v2126_v7  ;;  %1528 = vmatprep.subr.bf16.mxu0 %v2132_v8  ;;  %v2216_v22 = vld [vmem:[%s2811_s3 + $0x10] sm:$0xff]   ;;  %v2228_v24 = vld [vmem:[%s2811_s3 + $0x48] sm:$0xff]   ;;  %v2252_v29 = vld [vmem:[%s2811_s3 + $0x40] sm:$0xff]  }
   0xa   :  { %1550 = vmatprep.subr.bf16.mxu1 %v2138_v9  ;;  %2864 = vst [vmem:[#allocation14_spill] sm:$0xff] %v2216_v22  ;;  %v2222_v23 = vld [vmem:[%s2811_s3 + $0x90] sm:$0xff]   ;;  %2865 = vst [vmem:[#allocation15_spill] sm:$0xff] %v2228_v24  ;;  %v2234_v25 = vld [vmem:[%s2811_s3 + $0xc8] sm:$0xff]  }
   0xb   :  { %v2240_v26 = vld [vmem:[%s2811_s3 + $0x8] sm:$0xff]   ;;  %2867 = vst [vmem:[#allocation17_spill] sm:$0xff] %v2252_v29  ;;  %v2258_v30 = vld [vmem:[%s2811_s3 + $0xc0] sm:$0xff]   ;;  %v2279_v35 = vld [vmem:[%s2811_s3 + $0x178] sm:$0xff]  }
   0xc   :  { %1529 = vmatpush3.bf16.msra.mxu0 %v2144_v10  ;;  %2866 = vst [vmem:[#allocation16_spill] sm:$0xff] %v2240_v26  ;;  %v2246_v27 = vld [vmem:[%s2811_s3 + $0x88] sm:$0xff]   ;;  %v2264_v31 = vld [vmem:[%s2811_s3] sm:$0xff]   ;;  %2869 = vst [vmem:[#allocation19_spill] sm:$0xff] %v2279_v35 }
   0xd   :  { %1551 = vmatpush3.bf16.msra.mxu1 %v2150_v11  ;;  %1530 = vmatprep.subr.bf16.mxu0 %v2156_v12  ;;  %2868 = vst [vmem:[#allocation18_spill] sm:$0xff] %v2264_v31  ;;  %v2270_v32 = vld [vmem:[%s2811_s3 + $0x80] sm:$0xff]   ;;  %v2286_v38 = vld [vmem:[%s2811_s3 + $0x1f8] sm:$0xff]   ;;  %v2313_v52 = vld [vmem:[%s2811_s3 + $0x170] sm:$0xff]  }
   0xe   :  { %1552 = vmatprep.subr.bf16.mxu1 %v2162_v13  ;;  %v190_v34 = vld [vmem:[%s2808_s0] sm:$0xff]  ;;  %v2301_v47 = vld [vmem:[%s2811_s3 + $0x138] sm:$0xff]   ;;  %v2318_v54 = vld [vmem:[%s2811_s3 + $0x1f0] sm:$0xff]  }
   0xf   :  { %v192_v39 = vcombine.high %v190_v34, %v190_v34  ;;  %v199_v42 = vrot.slane %v190_v34, %v2289_v41  ;;  %v2307_v49 = vld [vmem:[%s2811_s3 + $0x1b8] sm:$0xff]   ;;  %v2323_v55 = vld [vmem:[%s2811_s3 + $0x130] sm:$0xff]   ;;  %v2335_v58 = vld [vmem:[%s2811_s3 + $0x168] sm:$0xff]  }
  0x10   :  { %1531 = vmatpush3.bf16.msra.mxu0 %v2168_v14  ;;  %v2329_v57 = vld [vmem:[%s2811_s3 + $0x1b0] sm:$0xff]   ;;  %v2341_v59 = vld [vmem:[%s2811_s3 + $0x1e8] sm:$0xff]   ;;  %v2359_v62 = vld [vmem:[%s2811_s3 + $0x160] sm:$0xff]  }
  0x11   :  { %1553 = vmatpush3.bf16.msra.mxu1 %v2174_v15  ;;  %1532 = vmatprep.subr.bf16.mxu0 %v2180_v16  ;;  %v2293_v43 = vrot.slane %v192_v39, %v2289_v41  ;;  %v207_v44 = vcombine.high %v199_v42, %v199_v42  ;;  %v215_v45 = vrot.slane %v199_v42, %v2289_v41  ;;  %v2347_v60 = vld [vmem:[%s2811_s3 + $0x128] sm:$0xff]   ;;  %v2365_v63 = vld [vmem:[%s2811_s3 + $0x1e0] sm:$0xff]   ;;  %v2383_v34 = vld [vmem:[%s2811_s3 + $0x158] sm:$0xff]  }
  0x12   :  { %1554 = vmatprep.subr.bf16.mxu1 %v2186_v17  ;;  %2870 = vst [vmem:[#allocation20_spill] sm:$0xff] %v2347_v60  ;;  %v2353_v61 = vld [vmem:[%s2811_s3 + $0x1a8] sm:$0xff]   ;;  %2871 = vst [vmem:[#allocation21_spill] sm:$0xff] %v2359_v62  ;;  %v2371_v28 = vld [vmem:[%s2811_s3 + $0x120] sm:$0xff]  }
  0x13   :  { %v208_v46 = vcombine.high %v2293_v43, %v2293_v43  ;;  %v229_v48 = vrot.slane %v207_v44, %v2289_v41  ;;  %v237_v51 = vcombine.high %v215_v45, %v215_v45  ;;  %2872 = vst [vmem:[#allocation22_spill] sm:$0xff] %v2371_v28  ;;  %v2377_v33 = vld [vmem:[%s2811_s3 + $0x1a0] sm:$0xff]   ;;  %2873 = vst [vmem:[#allocation23_spill] sm:$0xff] %v2383_v34  ;;  %v2389_v36 = vld [vmem:[%s2811_s3 + $0x1d8] sm:$0xff]  }
  0x14   :  { %1533 = vmatpush3.bf16.msra.mxu0 %v2192_v18  ;;  %v2395_v37 = vld [vmem:[%s2811_s3 + $0x118] sm:$0xff]   ;;  %v2407_v40 = vld [vmem:[%s2811_s3 + $0x150] sm:$0xff]  }
  0x15   :  { %1555 = vmatpush3.bf16.msra.mxu1 %v2198_v19  ;;  %1534 = vmatprep.subr.bf16.mxu0 %v2204_v20  ;;  %v236_v50 = vrot.slane %v208_v46, %v2289_v41  ;;  %v239_v53 = vcombine.high %v229_v48, %v229_v48  ;;  %2874 = vst [vmem:[#allocation24_spill] sm:$0xff] %v2395_v37  ;;  %v2401_v39 = vld [vmem:[%s2811_s3 + $0x198] sm:$0xff]   ;;  %2876 = vst [vmem:[#allocation26_spill] sm:$0xff] %v2407_v40  ;;  %v2413_v42 = vld [vmem:[%s2811_s3 + $0x1d0] sm:$0xff]  }
  0x16   :  { %1556 = vmatprep.subr.bf16.mxu1 %v2210_v21  ;;  %665 = vmatprep.mubr.bf16.mxu0 %v229_v48  ;;  %2875 = vst [vmem:[#allocation25_spill] sm:$0xff] %v2401_v39  ;;  %2877 = vst [vmem:[#allocation27_spill] sm:$0xff] %v2413_v42  ;;  %v2419_v44 = vld [vmem:[%s2811_s3 + $0x110] sm:$0xff]   ;;  %v2430_v46 = vld [vmem:[%s2811_s3 + $0x148] sm:$0xff]  }
  0x17   :  { %v240_v56 = vcombine.high %v236_v50, %v236_v50  ;;  %705 = vmatprep.mubr.bf16.mxu1 %v239_v53  ;;  %2878 = vst [vmem:[#allocation28_spill] sm:$0xff] %v2419_v44  ;;  %2880 = vst [vmem:[#allocation30_spill] sm:$0xff] %v2430_v46  ;;  %v2436_v48 = vld [vmem:[%s2811_s3 + $0x1c8] sm:$0xff]  }
  0x18   :  { %1535 = vmatpush3.bf16.msra.mxu0 %v2216_v22  ;;  %2881 = vst [vmem:[#allocation31_spill] sm:$0xff] %v2436_v48  ;;  %v2454_v53 = vld [vmem:[%s2811_s3 + $0x188] sm:$0xff]  }
  0x19   :  { %1557 = vmatpush3.bf16.msra.mxu1 %v2222_v23  ;;  %1536 = vmatprep.subr.bf16.mxu0 %v2228_v24 }
  0x1a   :  { %1558 = vmatprep.subr.bf16.mxu1 %v2234_v25 }
  0x1c   :  { %1537 = vmatpush3.bf16.msra.mxu0 %v2240_v26 }
  0x1d   :  { %1559 = vmatpush3.bf16.msra.mxu1 %v2246_v27  ;;  %1538 = vmatprep.subr.bf16.mxu0 %v2252_v29 }
  0x1e   :  { %1560 = vmatprep.subr.bf16.mxu1 %v2258_v30 }
  0x20   :  { %1539 = vmatpush3.bf16.msra.mxu0 %v2264_v31 }
  0x21   :  { %1561 = vmatpush3.bf16.msra.mxu1 %v2270_v32  ;;  %1568 = vmatprep.subr.bf16.mxu0 %v2279_v35 }
  0x22   :  { %1590 = vmatprep.subr.bf16.mxu1 %v2286_v38 }
  0x23   :  { %666 = vmatmul.mubr.bf16.vlgmr.msra.gmra.mxu0 %v215_v45  ;;  %v2425_v45 = vld [vmem:[%s2811_s3 + $0x190] sm:$0xff]  }
  0x24   :  { %1569 = vmatpush3.bf16.msra.mxu0 %v2301_v47  ;;  %706 = vmatmul.mubr.bf16.vlgmr.msra.gmra.mxu1 %v237_v51  ;;  %2879 = vst [vmem:[#allocation29_spill] sm:$0xff] %v2425_v45  ;;  %v2448_v51 = vld [vmem:[%s2811_s3 + $0x140] sm:$0xff]  }
  0x25   :  { %1570 = vmatprep.subr.bf16.mxu0 %v2313_v52  ;;  %1591 = vmatpush3.bf16.msra.mxu1 %v2307_v49  ;;  %2883 = vst [vmem:[#allocation33_spill] sm:$0xff] %v2448_v51 }
  0x26   :  { %745 = vmatprep.mubr.bf16.mxu0 %v236_v50  ;;  %1592 = vmatprep.subr.bf16.mxu1 %v2318_v54  ;;  %v2442_v50 = vld [vmem:[%s2811_s3 + $0x108] sm:$0xff]  }
  0x27   :  { %785 = vmatprep.mubr.bf16.mxu1 %v240_v56  ;;  %2882 = vst [vmem:[#allocation32_spill] sm:$0xff] %v2442_v50 }
  0x28   :  { %1571 = vmatpush3.bf16.msra.mxu0 %v2323_v55 }
  0x29   :  { %1572 = vmatprep.subr.bf16.mxu0 %v2335_v58  ;;  %1593 = vmatpush3.bf16.msra.mxu1 %v2329_v57 }
  0x2a   :  { %1594 = vmatprep.subr.bf16.mxu1 %v2341_v59 }
  0x2c   :  { %1573 = vmatpush3.bf16.msra.mxu0 %v2347_v60 }
  0x2d   :  { %1574 = vmatprep.subr.bf16.mxu0 %v2359_v62  ;;  %1595 = vmatpush3.bf16.msra.mxu1 %v2353_v61 }
  0x2e   :  { %1596 = vmatprep.subr.bf16.mxu1 %v2365_v63 }
  0x30   :  { %1575 = vmatpush3.bf16.msra.mxu0 %v2371_v28 }
  0x31   :  { %1576 = vmatprep.subr.bf16.mxu0 %v2383_v34  ;;  %1597 = vmatpush3.bf16.msra.mxu1 %v2377_v33 }
  0x32   :  { %1598 = vmatprep.subr.bf16.mxu1 %v2389_v36 }
  0x34   :  { %1577 = vmatpush3.bf16.msra.mxu0 %v2395_v37 }
  0x35   :  { %1578 = vmatprep.subr.bf16.mxu0 %v2407_v40  ;;  %1599 = vmatpush3.bf16.msra.mxu1 %v2401_v39 }
  0x36   :  { %1600 = vmatprep.subr.bf16.mxu1 %v2413_v42 }
  0x38   :  { %1579 = vmatpush3.bf16.msra.mxu0 %v2419_v44 }
  0x39   :  { %1580 = vmatprep.subr.bf16.mxu0 %v2430_v46  ;;  %1601 = vmatpush3.bf16.msra.mxu1 %v2425_v45 }
  0x3a   :  { %16 = vsyncpa [#allocation5], 0  ;;  %1602 = vmatprep.subr.bf16.mxu1 %v2436_v48  ;;  %v2462_v56 = vld [vmem:[%s2811_s3 + $0x1c0] sm:$0xff]   ;;  %v222_v45 = vrot.slane %v2293_v43, %v2289_v41  ;;  %v2502_v43 = vld [vmem:[%s2813_s5 + $0x38] sm:$0xff]   ;;  %vm2028_vm0 = vmmov 0   ;;  %vm883_vm1 = vcmask 517120  }
  0x3b   :  { %v2468_v42 = vld [vmem:[%s2811_s3 + $0x100] sm:$0xff]   ;;  %2885 = vst [vmem:[#allocation35_spill] sm:$0xff] %v2502_v43  ;;  %s2030_s19 = smov [#allocation2]  }
  0x3c   :  { %1581 = vmatpush3.bf16.msra.mxu0 %v2442_v50  ;;  %2884 = vst [vmem:[#allocation34_spill] sm:$0xff] %v2468_v42  ;;  %v2477_v48 = vld [vmem:[%s2811_s3 + $0x180] sm:$0xff]   ;;  %v238_v39 = vcombine.high %v222_v45, %v222_v45  ;;  %s1415_s20 = sshll.u32 %s2030_s19, 4  ;;  %s1416_s20 = int_to_ptr.vmem [resolvable:$true] %s1415_s20 }
  0x3d   :  { %1582 = vmatprep.subr.bf16.mxu0 %v2448_v51  ;;  %1603 = vmatpush3.bf16.msra.mxu1 %v2454_v53 }
  0x3e   :  { %1604 = vmatprep.subr.bf16.mxu1 %v2462_v56 }
  0x40   :  { %1583 = vmatpush3.bf16.msra.mxu0 %v2468_v42 }
  0x41   :  { %1605 = vmatpush3.bf16.msra.mxu1 %v2477_v48 }
  0x42   :  { %1621 = vmatprep.subr.bf16.mxu1 %v2085_v0 }
  0x43   :  { %746 = vmatmul.mubr.bf16.vlgmr.msra.gmra.mxu0 %v222_v45  ;;  %v2509_v45 = vld [vmem:[%s2813_s5 + $0x30] sm:$0xff]  }
  0x44   :  { %786 = vmatmul.mubr.bf16.vlgmr.msra.gmra.mxu1 %v238_v39  ;;  %v2837_v39 = vmov 0.0   ;;  %2886 = vst [vmem:[#allocation36_spill] sm:$0xff] %v2509_v45 }
  0x45   :  { %1622 = vmatpush3.bf16.msra.mxu1 %v2096_v2  ;;  %1815 = vmatprep.subr.bf16.mxu0 %v2837_v39 }
  0x46   :  { %1623 = vmatprep.subr.bf16.mxu1 %v2108_v4  ;;  %1816 = vmatpush3.bf16.msra.mxu0 %v2502_v43 }
  0x47   :  { %1817 = vmatprep.subr.bf16.mxu0 %v2837_v39  ;;  %1831 = vmatprep.mubr.msk.bf16.mxu0 %vm2028_vm0, %v2837_v39 }
  0x49   :  { %1624 = vmatpush3.bf16.msra.mxu1 %v2120_v6 }
  0x4a   :  { %1625 = vmatprep.subr.bf16.mxu1 %v2132_v8  ;;  %1818 = vmatpush3.bf16.msra.mxu0 %v2509_v45 }
  0x4b   :  { %1819 = vmatprep.subr.bf16.mxu0 %v2837_v39 }
  0x4d   :  { %1626 = vmatpush3.bf16.msra.mxu1 %v2144_v10 }
  0x4e   :  { %1627 = vmatprep.subr.bf16.mxu1 %v2156_v12 }
  0x51   :  { %1628 = vmatpush3.bf16.msra.mxu1 %v2168_v14 }
  0x52   :  { %1629 = vmatprep.subr.bf16.mxu1 %v2180_v16 }
  0x55   :  { %1630 = vmatpush3.bf16.msra.mxu1 %v2192_v18 }
  0x56   :  { %1631 = vmatprep.subr.bf16.mxu1 %v2204_v20  ;;  %v885_v20 = vld [vmem:[%s2809_s1] sm:$0xff] }
  0x57   :  { %v894_v18 = vrot.slane %v885_v20, %v2289_v41 }
  0x59   :  { %1632 = vmatpush3.bf16.msra.mxu1 %v2216_v22  ;;  %v2552_v22 = vld [vmem:[%s2813_s5] sm:$0xff]   ;;  %v902_v16 = vcombine.high %v894_v18, %v894_v18  ;;  %v2566_v12 = vrot.slane %v894_v18, %v2289_v41 }
  0x5a   :  { %1633 = vmatprep.subr.bf16.mxu1 %v2228_v24  ;;  %v2545_v24 = vld [vmem:[%s2813_s5 + $0x8] sm:$0xff]   ;;  %2892 = vst [vmem:[#allocation42_spill] sm:$0xff] %v2552_v22 }
  0x5b   :  { %2891 = vst [vmem:[#allocation41_spill] sm:$0xff] %v2545_v24  ;;  %v2563_v14 = vrot.slane %v902_v16, %v2289_v41  ;;  %v887_v16 = vcombine.high %v885_v20, %v885_v20 }
  0x5d   :  { %1634 = vmatpush3.bf16.msra.mxu1 %v2240_v26  ;;  %v2538_v26 = vld [vmem:[%s2813_s5 + $0x10] sm:$0xff]   ;;  %976 = vmatprep.mubr.bf16.mxu1 %v2563_v14  ;;  %v901_v18 = vrot.slane %v887_v16, %v2289_v41 }
  0x5e   :  { %1635 = vmatprep.subr.bf16.mxu1 %v2252_v29  ;;  %v2530_v29 = vld [vmem:[%s2813_s5 + $0x18] sm:$0xff]   ;;  %2890 = vst [vmem:[#allocation40_spill] sm:$0xff] %v2538_v26 }
  0x5f   :  { %2889 = vst [vmem:[#allocation39_spill] sm:$0xff] %v2530_v29 }
  0x61   :  { %1636 = vmatpush3.bf16.msra.mxu1 %v2264_v31  ;;  %v2523_v31 = vld [vmem:[%s2813_s5 + $0x20] sm:$0xff]  }
  0x62   :  { %1665 = vmatprep.subr.bf16.mxu1 %v2279_v35  ;;  %v2516_v35 = vld [vmem:[%s2813_s5 + $0x28] sm:$0xff]   ;;  %2888 = vst [vmem:[#allocation38_spill] sm:$0xff] %v2523_v31 }
  0x63   :  { %2887 = vst [vmem:[#allocation37_spill] sm:$0xff] %v2516_v35  ;;  %1820 = vmatpush3.bf16.msra.mxu0 %v2516_v35 }
  0x64   :  { %1821 = vmatprep.subr.bf16.mxu0 %v2837_v39  ;;  %977 = vmatmul.mubr.bf16.vlgmr.msra.gmra.mxu1 %v2566_v12 }
  0x65   :  { %1666 = vmatpush3.bf16.msra.mxu1 %v2301_v47 }
  0x66   :  { %1667 = vmatprep.subr.bf16.mxu1 %v2313_v52 }
  0x67   :  { %1822 = vmatpush3.bf16.msra.mxu0 %v2523_v31 }
  0x68   :  { %1823 = vmatprep.subr.bf16.mxu0 %v2837_v39 }
  0x69   :  { %1668 = vmatpush3.bf16.msra.mxu1 %v2323_v55 }
  0x6a   :  { %1669 = vmatprep.subr.bf16.mxu1 %v2335_v58 }
  0x6b   :  { %1824 = vmatpush3.bf16.msra.mxu0 %v2530_v29 }
  0x6c   :  { %1825 = vmatprep.subr.bf16.mxu0 %v2837_v39 }
  0x6d   :  { %1670 = vmatpush3.bf16.msra.mxu1 %v2347_v60 }
  0x6e   :  { %1671 = vmatprep.subr.bf16.mxu1 %v2359_v62  ;;  %v934_v62 = vcombine.high %v2563_v14, %v2563_v14 }
  0x6f   :  { %1826 = vmatpush3.bf16.msra.mxu0 %v2538_v26 }
  0x70   :  { %1827 = vmatprep.subr.bf16.mxu0 %v2837_v39 }
  0x71   :  { %1672 = vmatpush3.bf16.msra.mxu1 %v2371_v28 }
  0x72   :  { %1673 = vmatprep.subr.bf16.mxu1 %v2383_v34 }
  0x73   :  { %1828 = vmatpush3.bf16.msra.mxu0 %v2545_v24 }
  0x74   :  { %1829 = vmatprep.subr.bf16.mxu0 %v2837_v39  ;;  %v903_v39 = vcombine.high %v901_v18, %v901_v18 }
  0x75   :  { %1674 = vmatpush3.bf16.msra.mxu1 %v2395_v37  ;;  %v2590_v37 = vrot.slane %v901_v18, %v2289_v41 }
  0x76   :  { %1675 = vmatprep.subr.bf16.mxu1 %v2407_v40  ;;  %v2586_v28 = vrot.slane %v903_v39, %v2289_v41 }
  0x77   :  { %1830 = vmatpush3.bf16.msra.mxu0 %v2552_v22 }
  0x78   :  { %1643 = vmatprep.subr.bf16.mxu0 %v2090_v1  ;;  %1056 = vmatprep.mubr.bf16.mxu1 %v2586_v28 }
  0x79   :  { %1676 = vmatpush3.bf16.msra.mxu1 %v2419_v44  ;;  %v2893_v44 = vmov 0.0  }
  0x7a   :  { %1677 = vmatprep.subr.bf16.mxu1 %v2430_v46 }
  0x7d   :  { %1678 = vmatpush3.bf16.msra.mxu1 %v2442_v50 }
  0x7e   :  { %1679 = vmatprep.subr.bf16.mxu1 %v2448_v51 }
  0x81   :  { %1680 = vmatpush3.bf16.msra.mxu1 %v2468_v42 }
  0x82   :  { %1835 = vmatprep.subr.bf16.mxu1 %v2893_v44 }
  0x84   :  { %1057 = vmatmul.mubr.bf16.vlgmr.msra.gmra.mxu1 %v2590_v37 }
  0x85   :  { %1836 = vmatpush3.bf16.msra.mxu1 %v2502_v43  ;;  %1851 = vmatprep.mubr.msk.bf16.mxu1 %vm2028_vm0, %v2893_v44 }
  0x86   :  { %1837 = vmatprep.subr.bf16.mxu1 %v2893_v44 }
  0x89   :  { %1838 = vmatpush3.bf16.msra.mxu1 %v2509_v45 }
  0x8a   :  { %1839 = vmatprep.subr.bf16.mxu1 %v2893_v44 }
  0x8d   :  { %1840 = vmatpush3.bf16.msra.mxu1 %v2516_v35 }
  0x8e   :  { %1841 = vmatprep.subr.bf16.mxu1 %v2893_v44 }
  0x91   :  { %1842 = vmatpush3.bf16.msra.mxu1 %v2523_v31 }
  0x92   :  { %1843 = vmatprep.subr.bf16.mxu1 %v2893_v44 }
  0x95   :  { %1844 = vmatpush3.bf16.msra.mxu1 %v2530_v29 }
  0x96   :  { %1845 = vmatprep.subr.bf16.mxu1 %v2893_v44 }
  0x99   :  { %1846 = vmatpush3.bf16.msra.mxu1 %v2538_v26  ;;  %v2616_v26 = vld [vmem:[%s2812_s4] ss:$0 sm:$0xff] }
  0x9a   :  { %1847 = vmatprep.subr.bf16.mxu1 %v2893_v44 }
  0x9d   :  { %1848 = vmatpush3.bf16.msra.mxu1 %v2545_v24 }
  0x9e   :  { %1849 = vmatprep.subr.bf16.mxu1 %v2893_v44 }
  0xa1   :  { %1850 = vmatpush3.bf16.msra.mxu1 %v2552_v22 }
  0xa2   :  { %1740 = vmatprep.subr.bf16.mxu1 %v2090_v1 }
  0xe3   :  { %v1540_v20 = vpop.f32.mrf.mxu0 }
  0xe4   :  { %v1562_v39 = vpop.f32.mrf.mxu1 }
  0xe5   :  { %v1541_v16 = vpop.f32.mrf.mxu0 }
  0xe6   :  { %v1563_v18 = vpop.f32.mrf.mxu1  ;;  %v1542_v43 = vadd.f32 %v1541_v16, %v1540_v20 }
  0xe7   :  { %v1543_v31 = vpop.f32.mrf.mxu0  ;;  %v1564_v44 = vadd.f32 %v1563_v18, %v1562_v39  ;;  %v1147_v39 = vld [vmem:[%s2810_s2] sm:$0xff] }
  0xe8   :  { %v1565_v29 = vpop.f32.mrf.mxu1  ;;  %v668_v24 = vadd.f32 %v1542_v43, %v2616_v26  ;;  %v1156_v18 = vrot.slane %v1147_v39, %v2289_v41 }
  0xe9   :  { %v1544_v35 = vpop.f32.mrf.mxu0 }
  0xea   :  { %v1566_v45 = vpop.f32.mrf.mxu1  ;;  %v708_v51 = vadd.f32 %v1564_v44, %v668_v24 }
 0x103   :  { %v1584_v22 = vpop.f32.mrf.mxu0 }
 0x104   :  { %v1606_v42 = vpop.f32.mrf.mxu1 }
 0x105   :  { %v1585_v1 = vpop.f32.mrf.mxu0 }
 0x106   :  { %v1586_v50 = vadd.f32 %v1585_v1, %v1584_v22  ;;  %v1607_v46 = vpop.f32.mrf.mxu1  ;;  %v1164_v1 = vcombine.high %v1156_v18, %v1156_v18 }
 0x107   :  { %v1587_v40 = vpop.f32.mrf.mxu0  ;;  %v1608_v29 = vadd.f32 %v1607_v46, %v1606_v42  ;;  %v2908_v42 = vld [vmem:[#allocation19_spill] sm:$0xff] }
 0x108   :  { %v748_v31 = vadd.f32 %v1586_v50, %v708_v51  ;;  %v1609_v35 = vpop.f32.mrf.mxu1  ;;  %v2906_v40 = vld [vmem:[#allocation17_spill] sm:$0xff] }
 0x109   :  { %v1588_v45 = vpop.f32.mrf.mxu0  ;;  %v2909_v35 = vld [vmem:[#allocation20_spill] sm:$0xff] }
 0x10a   :  { %v788_v20 = vadd.f32 %v1608_v29, %v748_v31  ;;  %v1610_v16 = vpop.f32.mrf.mxu1  ;;  %v2684_v31 = vrot.slane %v1164_v1, %v2289_v41  ;;  %v2687_v29 = vrot.slane %v1156_v18, %v2289_v41  ;;  %v2910_v45 = vld [vmem:[#allocation21_spill] sm:$0xff] }
 0x10b   :  { %v2912_v16 = vld [vmem:[#allocation23_spill] sm:$0xff] }
 0x10c   :  { %v793_v34 = vmax.f32 %v788_v20, 0.0  ;;  %v2911_v20 = vld [vmem:[#allocation22_spill] sm:$0xff] }
 0x10e   :  { %v794_v60 = vpack.c.bf16 %v793_v34, %v793_v34  ;;  %v2900_v34 = vld [vmem:[#allocation11_spill] sm:$0xff] }
 0x110   :  { %1832 = vmatmul.mubr.bf16.vlgmr.msra.gmra.mxu0 %v794_v60 }
 0x111   :  { %1644 = vmatpush3.bf16.msra.mxu0 %v2102_v3  ;;  %1016 = vmatprep.mubr.bf16.mxu0 %v934_v62  ;;  %v932_v3 = vcombine.high %v2566_v12, %v2566_v12  ;;  %v2897_v12 = vld [vmem:[#allocation31_spill] sm:$0xff]  ;;  %v2898_v62 = vld [vmem:[#allocation9_spill] sm:$0xff] }
 0x112   :  { %1645 = vmatprep.subr.bf16.mxu0 %v2114_v5  ;;  %v935_v5 = vcombine.high %v2586_v28, %v2586_v28 }
 0x115   :  { %1646 = vmatpush3.bf16.msra.mxu0 %v2126_v7  ;;  %v2894_v7 = vld [vmem:[#allocation25_spill] sm:$0xff] }
 0x116   :  { %1647 = vmatprep.subr.bf16.mxu0 %v2138_v9  ;;  %v2895_v9 = vld [vmem:[#allocation27_spill] sm:$0xff] }
 0x119   :  { %1648 = vmatpush3.bf16.msra.mxu0 %v2150_v11  ;;  %v2896_v11 = vld [vmem:[#allocation29_spill] sm:$0xff] }
 0x11a   :  { %1649 = vmatprep.subr.bf16.mxu0 %v2162_v13  ;;  %v933_v13 = vcombine.high %v2590_v37, %v2590_v37  ;;  %v2905_v37 = vld [vmem:[#allocation16_spill] sm:$0xff] }
 0x11d   :  { %1650 = vmatpush3.bf16.msra.mxu0 %v2174_v15 }
 0x11e   :  { %1651 = vmatprep.subr.bf16.mxu0 %v2186_v17 }
 0x121   :  { %1652 = vmatpush3.bf16.msra.mxu0 %v2198_v19 }
 0x122   :  { %1653 = vmatprep.subr.bf16.mxu0 %v2210_v21 }
 0x124   :  { %v1637_v14 = vpop.f32.mrf.mxu1 }
 0x125   :  { %1654 = vmatpush3.bf16.msra.mxu0 %v2222_v23 }
 0x126   :  { %1655 = vmatprep.subr.bf16.mxu0 %v2234_v25  ;;  %v1638_v22 = vpop.f32.mrf.mxu1 }
 0x127   :  { %v2663_v24 = vadd.f32 %v1638_v22, %v1637_v14  ;;  %v2918_v14 = vld [vmem:[#allocation33_spill] sm:$0xff] }
 0x128   :  { %v1640_v60 = vpop.f32.mrf.mxu1 }
 0x129   :  { %1656 = vmatpush3.bf16.msra.mxu0 %v2246_v27  ;;  %v979_v18 = vadd.f32 %v2663_v24, %v2616_v26  ;;  %v1956_v24 = vld [vmem:[%s2811_s3 + $0xb8] sm:$0xff]  }
 0x12a   :  { %1657 = vmatprep.subr.bf16.mxu0 %v2258_v30  ;;  %v1641_v28 = vpop.f32.mrf.mxu1 }
 0x12d   :  { %1658 = vmatpush3.bf16.msra.mxu0 %v2270_v32 }
 0x12e   :  { %1687 = vmatprep.subr.bf16.mxu0 %v2286_v38 }
 0x130   :  { %1017 = vmatmul.mubr.bf16.vlgmr.msra.gmra.mxu0 %v932_v3  ;;  %v2913_v3 = vld [vmem:[#allocation24_spill] sm:$0xff] }
 0x131   :  { %1688 = vmatpush3.bf16.msra.mxu0 %v2307_v49  ;;  %1096 = vmatprep.mubr.bf16.mxu0 %v935_v5  ;;  %v2914_v5 = vld [vmem:[#allocation26_spill] sm:$0xff] }
 0x132   :  { %1689 = vmatprep.subr.bf16.mxu0 %v2318_v54 }
 0x135   :  { %1690 = vmatpush3.bf16.msra.mxu0 %v2329_v57 }
 0x136   :  { %1691 = vmatprep.subr.bf16.mxu0 %v2341_v59 }
 0x139   :  { %1692 = vmatpush3.bf16.msra.mxu0 %v2353_v61 }
 0x13a   :  { %1693 = vmatprep.subr.bf16.mxu0 %v2365_v63 }
 0x13d   :  { %1694 = vmatpush3.bf16.msra.mxu0 %v2377_v33 }
 0x13e   :  { %1695 = vmatprep.subr.bf16.mxu0 %v2389_v36 }
 0x141   :  { %1696 = vmatpush3.bf16.msra.mxu0 %v2894_v7 }
 0x142   :  { %1697 = vmatprep.subr.bf16.mxu0 %v2895_v9 }
 0x144   :  { %v1681_v44 = vpop.f32.mrf.mxu1 }
 0x145   :  { %1698 = vmatpush3.bf16.msra.mxu0 %v2896_v11 }
 0x146   :  { %1699 = vmatprep.subr.bf16.mxu0 %v2897_v12  ;;  %v1682_v46 = vpop.f32.mrf.mxu1 }
 0x147   :  { %v2677_v50 = vadd.f32 %v1682_v46, %v1681_v44 }
 0x148   :  { %v1684_v51 = vpop.f32.mrf.mxu1 }
 0x149   :  { %1700 = vmatpush3.bf16.msra.mxu0 %v2454_v53  ;;  %v2927_v51 = vld [vmem:[#allocation41_spill] sm:$0xff] }
 0x14a   :  { %1701 = vmatprep.subr.bf16.mxu0 %v2462_v56  ;;  %v1685_v43 = vpop.f32.mrf.mxu1 }
 0x14b   :  { %v2928_v43 = vld [vmem:[#allocation42_spill] sm:$0xff] }
 0x14d   :  { %1702 = vmatpush3.bf16.msra.mxu0 %v2477_v48 }
 0x14e   :  { %1718 = vmatprep.subr.bf16.mxu0 %v2085_v0  ;;  %v2899_v0 = vld [vmem:[#allocation10_spill] sm:$0xff] }
 0x150   :  { %1097 = vmatmul.mubr.bf16.vlgmr.msra.gmra.mxu0 %v933_v13  ;;  %v2915_v13 = vld [vmem:[#allocation28_spill] sm:$0xff] }
 0x151   :  { %1719 = vmatpush3.bf16.msra.mxu0 %v2096_v2  ;;  %v2901_v2 = vld [vmem:[#allocation12_spill] sm:$0xff]  ;;  %1238 = vmatprep.mubr.bf16.mxu0 %v2684_v31 }
 0x152   :  { %1720 = vmatprep.subr.bf16.mxu0 %v2108_v4  ;;  %v2902_v4 = vld [vmem:[#allocation13_spill] sm:$0xff] }
 0x155   :  { %1721 = vmatpush3.bf16.msra.mxu0 %v2120_v6  ;;  %v2903_v6 = vld [vmem:[#allocation14_spill] sm:$0xff] }
 0x156   :  { %1722 = vmatprep.subr.bf16.mxu0 %v2132_v8  ;;  %v2904_v8 = vld [vmem:[#allocation15_spill] sm:$0xff] }
 0x159   :  { %1723 = vmatpush3.bf16.msra.mxu0 %v2144_v10  ;;  %v2907_v10 = vld [vmem:[#allocation18_spill] sm:$0xff] }
 0x15a   :  { %1724 = vmatprep.subr.bf16.mxu0 %v2898_v62  ;;  %v2919_v62 = vld [vmem:[#allocation34_spill] sm:$0xff] }
 0x15d   :  { %1725 = vmatpush3.bf16.msra.mxu0 %v2899_v0  ;;  %v2920_v0 = vmov 0.0  }
 0x15e   :  { %1726 = vmatprep.subr.bf16.mxu0 %v2900_v34  ;;  %v2921_v34 = vld [vmem:[#allocation35_spill] sm:$0xff] }
 0x161   :  { %1727 = vmatpush3.bf16.msra.mxu0 %v2901_v2  ;;  %v2922_v2 = vld [vmem:[#allocation36_spill] sm:$0xff] }
 0x162   :  { %1728 = vmatprep.subr.bf16.mxu0 %v2902_v4  ;;  %v2923_v4 = vld [vmem:[#allocation37_spill] sm:$0xff] }
 0x165   :  { %1729 = vmatpush3.bf16.msra.mxu0 %v2903_v6  ;;  %v2729_v6 = vld [vmem:[%s2814_s6] ss:$0 sm:$0xff] }
 0x166   :  { %1730 = vmatprep.subr.bf16.mxu0 %v2904_v8  ;;  %v2925_v8 = vld [vmem:[#allocation39_spill] sm:$0xff] }
 0x169   :  { %1731 = vmatpush3.bf16.msra.mxu0 %v2905_v37 }
 0x16a   :  { %1732 = vmatprep.subr.bf16.mxu0 %v2906_v40 }
 0x16d   :  { %1733 = vmatpush3.bf16.msra.mxu0 %v2907_v10 }
 0x16e   :  { %1762 = vmatprep.subr.bf16.mxu0 %v2908_v42  ;;  %v2926_v42 = vld [vmem:[#allocation40_spill] sm:$0xff] }
 0x170   :  { %1239 = vmatmul.mubr.bf16.vlgmr.msra.gmra.mxu0 %v2687_v29 }
 0x171   :  { %1763 = vmatpush3.bf16.msra.mxu0 %v2301_v47  ;;  %v2916_v47 = vld [vmem:[#allocation30_spill] sm:$0xff] }
 0x172   :  { %1764 = vmatprep.subr.bf16.mxu0 %v2313_v52  ;;  %v1149_v52 = vcombine.high %v1147_v39, %v1147_v39 }
 0x175   :  { %1765 = vmatpush3.bf16.msra.mxu0 %v2323_v55  ;;  %v1163_v55 = vrot.slane %v1149_v52, %v2289_v41 }
 0x176   :  { %1766 = vmatprep.subr.bf16.mxu0 %v2335_v58  ;;  %v2917_v58 = vld [vmem:[#allocation32_spill] sm:$0xff] }
 0x177   :  { %v1165_v22 = vcombine.high %v1163_v55, %v1163_v55  ;;  %v2711_v28 = vrot.slane %v1163_v55, %v2289_v41 }
 0x179   :  { %1767 = vmatpush3.bf16.msra.mxu0 %v2909_v35  ;;  %v2707_v60 = vrot.slane %v1165_v22, %v2289_v41  ;;  %v2924_v41 = vld [vmem:[#allocation38_spill] sm:$0xff]  ;;  %v1196_v22 = vcombine.high %v2684_v31, %v2684_v31 }
 0x17a   :  { %1768 = vmatprep.subr.bf16.mxu0 %v2910_v45  ;;  %v1959_v31 = vld [vmem:[%s2811_s3 + $0xe8] sm:$0xff]  }
 0x17b   :  { %1318 = vmatprep.mubr.bf16.mxu0 %v2707_v60 }
 0x17d   :  { %1769 = vmatpush3.bf16.msra.mxu0 %v2911_v20 }
 0x17e   :  { %1770 = vmatprep.subr.bf16.mxu0 %v2912_v16 }
 0x181   :  { %1771 = vmatpush3.bf16.msra.mxu0 %v2913_v3 }
 0x182   :  { %1772 = vmatprep.subr.bf16.mxu0 %v2914_v5 }
 0x185   :  { %1773 = vmatpush3.bf16.msra.mxu0 %v2915_v13 }
 0x186   :  { %1774 = vmatprep.subr.bf16.mxu0 %v2916_v47 }
 0x189   :  { %1775 = vmatpush3.bf16.msra.mxu0 %v2917_v58 }
 0x18a   :  { %1776 = vmatprep.subr.bf16.mxu0 %v2918_v14 }
 0x18d   :  { %1777 = vmatpush3.bf16.msra.mxu0 %v2919_v62 }
 0x18e   :  { %1855 = vmatprep.subr.bf16.mxu0 %v2920_v0 }
 0x190   :  { %1319 = vmatmul.mubr.bf16.vlgmr.msra.gmra.mxu0 %v2711_v28 }
 0x191   :  { %1856 = vmatpush3.bf16.msra.mxu0 %v2921_v34  ;;  %1871 = vmatprep.mubr.msk.bf16.mxu0 %vm2028_vm0, %v2920_v0  ;;  %v1960_v34 = vld [vmem:[%s2811_s3 + $0xa8] sm:$0xff]  }
 0x192   :  { %1857 = vmatprep.subr.bf16.mxu0 %v2920_v0 }
 0x195   :  { %1858 = vmatpush3.bf16.msra.mxu0 %v2922_v2  ;;  %v1961_v2 = vld [vmem:[%s2811_s3 + $0xe0] sm:$0xff]  }
 0x196   :  { %1859 = vmatprep.subr.bf16.mxu0 %v2920_v0 }
 0x199   :  { %1860 = vmatpush3.bf16.msra.mxu0 %v2923_v4  ;;  %v1194_v4 = vcombine.high %v2687_v29, %v2687_v29 }
 0x19a   :  { %1861 = vmatprep.subr.bf16.mxu0 %v2920_v0 }
 0x19d   :  { %1862 = vmatpush3.bf16.msra.mxu0 %v2924_v41 }
 0x19e   :  { %1863 = vmatprep.subr.bf16.mxu0 %v2920_v0 }
 0x1a1   :  { %1864 = vmatpush3.bf16.msra.mxu0 %v2925_v8 }
 0x1a2   :  { %1865 = vmatprep.subr.bf16.mxu0 %v2920_v0 }
 0x1a5   :  { %1866 = vmatpush3.bf16.msra.mxu0 %v2926_v42 }
 0x1a6   :  { %1867 = vmatprep.subr.bf16.mxu0 %v2920_v0 }
 0x1a9   :  { %1868 = vmatpush3.bf16.msra.mxu0 %v2927_v51 }
 0x1aa   :  { %1869 = vmatprep.subr.bf16.mxu0 %v2920_v0  ;;  %v1958_v0 = vld [vmem:[%s2811_s3 + $0xb0] sm:$0xff]  }
 0x1ad   :  { %1870 = vmatpush3.bf16.msra.mxu0 %v2928_v43 }
 0x1d0   :  { %v877_v37 = vpop.f32.mrf.mxu0 }
 0x1d1   :  { %v878_v40 = vadd.f32 %v2729_v6, %v877_v37 }
 0x1d2   :  { %v1833_v10 = vpop.f32.mrf.mxu0 }
 0x1d3   :  { %884 = vst.msk [vmem:[#allocation2] sm:$0x3] %vm883_vm1, %v878_v40 }
 0x1d4   :  { %v880_v44 = vpop.f32.mrf.mxu0 }
 0x1d6   :  { %v1834_v46 = vpop.f32.mrf.mxu0 }
 0x1f0   :  { %v1659_v39 = vpop.f32.mrf.mxu0 }
 0x1f2   :  { %v1660_v1 = vpop.f32.mrf.mxu0 }
 0x1f3   :  { %v1661_v35 = vadd.f32 %v1660_v1, %v1659_v39 }
 0x1f4   :  { %v1662_v45 = vpop.f32.mrf.mxu0 }
 0x1f5   :  { %v1019_v20 = vadd.f32 %v1661_v35, %v979_v18 }
 0x1f6   :  { %v1663_v16 = vpop.f32.mrf.mxu0 }
 0x1f7   :  { %v1059_v3 = vadd.f32 %v2677_v50, %v1019_v20  ;;  %v1957_v50 = vld [vmem:[%s2811_s3 + $0xf0] sm:$0xff]   ;;  %s2029_s3 = smov [#allocation4]  }
 0x1f8   :  { %s1425_s18 = sshll.u32 %s2029_s3, 4  ;;  %s1426_s18 = int_to_ptr.vmem [resolvable:$true] %s1425_s18 }
 0x1f9   :  { %s1962_s21 = scalar_lea.vmem %s1426_s18, 32  ;;  %p1967_p1 = scmp.lt.s32.totalorder %s1426_s18, %s1426_s18 }
 0x1fa   :  { %p1963_p0 = scmp.ne.s32.totalorder %s1426_s18, %s1962_s21  ;;  %p1968_p2 = scmp.lt.s32.totalorder %s1962_s21, %s1962_s21 }
 0x1fc   :  { %p1969_p3 = por %p1968_p2, %p1967_p1 }
 0x1fe   :  { %p1970_p4 = pnand %p1969_p3, %p1963_p0 }
 0x210   :  { %v1703_v5 = vpop.f32.mrf.mxu0 }
 0x212   :  { %v1704_v13 = vpop.f32.mrf.mxu0 }
 0x213   :  { %v1705_v47 = vadd.f32 %v1704_v13, %v1703_v5 }
 0x214   :  { %v1706_v52 = vpop.f32.mrf.mxu0 }
 0x215   :  { %v1099_v55 = vadd.f32 %v1705_v47, %v1059_v3 }
 0x216   :  { %v1707_v58 = vpop.f32.mrf.mxu0 }
 0x217   :  { %v1104_v14 = vmax.f32 %v1099_v55, 0.0 }
 0x219   :  { %v1105_v62 = vpack.c.bf16 %v1104_v14, %v1104_v14 }
 0x21b   :  { %1852 = vmatmul.mubr.bf16.vlgmr.msra.gmra.mxu1 %v1105_v62 }
 0x21c   :  { %1741 = vmatpush3.bf16.msra.mxu1 %v1956_v24  ;;  %1278 = vmatprep.mubr.bf16.mxu1 %v1196_v22 }
 0x21d   :  { %1742 = vmatprep.subr.bf16.mxu1 %v1957_v50 }
 0x220   :  { %1743 = vmatpush3.bf16.msra.mxu1 %v1958_v0 }
 0x221   :  { %1744 = vmatprep.subr.bf16.mxu1 %v1959_v31 }
 0x224   :  { %1745 = vmatpush3.bf16.msra.mxu1 %v1960_v34 }
 0x225   :  { %1746 = vmatprep.subr.bf16.mxu1 %v1961_v2 }
 0x228   :  { %1747 = vmatpush3.bf16.msra.mxu1 %v2174_v15  ;;  %v1197_v15 = vcombine.high %v2707_v60, %v2707_v60 }
 0x229   :  { %1748 = vmatprep.subr.bf16.mxu1 %v2186_v17  ;;  %v1195_v17 = vcombine.high %v2711_v28, %v2711_v28 }
 0x22c   :  { %1749 = vmatpush3.bf16.msra.mxu1 %v2198_v19 }
 0x22d   :  { %1750 = vmatprep.subr.bf16.mxu1 %v2210_v21 }
 0x230   :  { %1751 = vmatpush3.bf16.msra.mxu1 %v2222_v23  ;;  %v1734_v19 = vpop.f32.mrf.mxu0 }
 0x231   :  { %1752 = vmatprep.subr.bf16.mxu1 %v2234_v25 }
 0x232   :  { %v1735_v21 = vpop.f32.mrf.mxu0 }
 0x233   :  { %v1736_v23 = vadd.f32 %v1735_v21, %v1734_v19 }
 0x234   :  { %1753 = vmatpush3.bf16.msra.mxu1 %v2246_v27  ;;  %v1737_v25 = vpop.f32.mrf.mxu0 }
 0x235   :  { %1754 = vmatprep.subr.bf16.mxu1 %v2258_v30 }
 0x236   :  { %v1738_v27 = vpop.f32.mrf.mxu0 }
 0x238   :  { %1755 = vmatpush3.bf16.msra.mxu1 %v2270_v32 }
 0x239   :  { %1784 = vmatprep.subr.bf16.mxu1 %v2286_v38 }
 0x23b   :  { %1279 = vmatmul.mubr.bf16.vlgmr.msra.gmra.mxu1 %v1194_v4 }
 0x23c   :  { %1785 = vmatpush3.bf16.msra.mxu1 %v2307_v49  ;;  %1358 = vmatprep.mubr.bf16.mxu1 %v1197_v15 }
 0x23d   :  { %1786 = vmatprep.subr.bf16.mxu1 %v2318_v54 }
 0x240   :  { %1787 = vmatpush3.bf16.msra.mxu1 %v2329_v57 }
 0x241   :  { %1788 = vmatprep.subr.bf16.mxu1 %v2341_v59 }
 0x244   :  { %1789 = vmatpush3.bf16.msra.mxu1 %v2353_v61 }
 0x245   :  { %1790 = vmatprep.subr.bf16.mxu1 %v2365_v63 }
 0x248   :  { %1791 = vmatpush3.bf16.msra.mxu1 %v2377_v33 }
 0x249   :  { %1792 = vmatprep.subr.bf16.mxu1 %v2389_v36 }
 0x24c   :  { %1793 = vmatpush3.bf16.msra.mxu1 %v2894_v7 }
 0x24d   :  { %1794 = vmatprep.subr.bf16.mxu1 %v2895_v9 }
 0x250   :  { %1795 = vmatpush3.bf16.msra.mxu1 %v2896_v11  ;;  %v1778_v30 = vpop.f32.mrf.mxu0 }
 0x251   :  { %1796 = vmatprep.subr.bf16.mxu1 %v2897_v12 }
 0x252   :  { %v1779_v32 = vpop.f32.mrf.mxu0 }
 0x253   :  { %v1780_v38 = vadd.f32 %v1779_v32, %v1778_v30 }
 0x254   :  { %1797 = vmatpush3.bf16.msra.mxu1 %v2454_v53  ;;  %v1781_v49 = vpop.f32.mrf.mxu0 }
 0x255   :  { %1798 = vmatprep.subr.bf16.mxu1 %v2462_v56 }
 0x256   :  { %v1782_v54 = vpop.f32.mrf.mxu0 }
 0x258   :  { %1799 = vmatpush3.bf16.msra.mxu1 %v2477_v48  ;;  %v1241_v48 = vadd.f32 %v1736_v23, %v2616_v26 }
 0x25b   :  { %1359 = vmatmul.mubr.bf16.vlgmr.msra.gmra.mxu1 %v1195_v17 }
 0x2db   :  { %v1140_v57 = vpop.f32.mrf.mxu1 }
 0x2dc   :  { %v1141_v59 = vadd.f32 %v2729_v6, %v1140_v57 }
 0x2dd   :  { %v1853_v61 = vpop.f32.mrf.mxu1 }
 0x2de   :  { %1146 = vst.msk [vmem:[#allocation4] sm:$0x3] %vm883_vm1, %v1141_v59 }
 0x2df   :  { %v1143_v63 = vpop.f32.mrf.mxu1 }
 0x2e1   :  { %v1854_v33 = vpop.f32.mrf.mxu1 }
 0x2fb   :  { %v1756_v36 = vpop.f32.mrf.mxu1 }
 0x2fd   :  { %v1757_v53 = vpop.f32.mrf.mxu1 }
 0x2fe   :  { %v1758_v56 = vadd.f32 %v1757_v53, %v1756_v36 }
 0x2ff   :  { %v1759_v7 = vpop.f32.mrf.mxu1 }
 0x300   :  { %v1281_v9 = vadd.f32 %v1758_v56, %v1241_v48 }
 0x301   :  { %v1760_v11 = vpop.f32.mrf.mxu1 }
 0x302   :  { %v1321_v12 = vadd.f32 %v1780_v38, %v1281_v9 }
 0x31b   :  { %v1800_v29 = vpop.f32.mrf.mxu1 }
 0x31d   :  { %v1801_v60 = vpop.f32.mrf.mxu1 }
 0x31e   :  { %v1802_v28 = vadd.f32 %v1801_v60, %v1800_v29 }
 0x31f   :  { %v1803_v41 = vpop.f32.mrf.mxu1 }
 0x320   :  { %v1361_v8 = vadd.f32 %v1802_v28, %v1321_v12 }
 0x321   :  { %v1804_v37 = vpop.f32.mrf.mxu1 }
 0x322   :  { %v1366_v40 = vmax.f32 %v1361_v8, 0.0 }
 0x324   :  { %v1367_v10 = vpack.c.bf16 %v1366_v40, %v1366_v40 }
 0x326   :  { %1872 = vmatmul.mubr.bf16.vlgmr.msra.gmra.mxu0 %v1367_v10 }
 0x327   :  { %1973 = shalt.err (!%p1970_p4)
}
 0x328   :  { %1428 = dma.vmem_to_hbm [thread:$0]  %s1426_s18, 32, %s2816_s8, [#allocation5]  }
 0x329   :  { %s1982_s24 = scalar_lea.vmem %s1416_s20, 32  ;;  %p1987_p6 = scmp.lt.s32.totalorder %s1416_s20, %s1416_s20 }
 0x32a   :  { %p1983_p5 = scmp.ne.s32.totalorder %s1416_s20, %s1982_s24  ;;  %p1988_p7 = scmp.lt.s32.totalorder %s1982_s24, %s1982_s24 }
 0x32c   :  { %p1989_p8 = por %p1988_p7, %p1987_p6 }
 0x32e   :  { %p1990_p9 = pnand %p1989_p8, %p1983_p5 }
 0x330   :  { %1993 = shalt.err (!%p1990_p9)
}
 0x331   :  { %1418 = dma.vmem_to_hbm [thread:$0]  %s1416_s20, 32, %s2815_s7, [#allocation3]  }
 0x332   :  { %s2031_s1 = smov [#allocation6]  }
 0x333   :  { %s1435_s5 = sshll.u32 %s2031_s1, 4  ;;  %s1436_s5 = int_to_ptr.vmem [resolvable:$true] %s1435_s5 }
 0x334   :  { %s2002_s8 = scalar_lea.vmem %s1436_s5, 32  ;;  %p2007_p11 = scmp.lt.s32.totalorder %s1436_s5, %s1436_s5 }
 0x335   :  { %p2003_p10 = scmp.ne.s32.totalorder %s1436_s5, %s2002_s8  ;;  %p2008_p12 = scmp.lt.s32.totalorder %s2002_s8, %s2002_s8 }
 0x337   :  { %p2009_p13 = por %p2008_p12, %p2007_p11 }
 0x339   :  { %p2010_p0 = pnand %p2009_p13, %p2003_p10 }
 0x3e6   :  { %v1402_v26 = vpop.f32.mrf.mxu0 }
 0x3e7   :  { %v1403_v42 = vadd.f32 %v2729_v6, %v1402_v26 }
 0x3e8   :  { %v1873_v44 = vpop.f32.mrf.mxu0 }
 0x3e9   :  { %1408 = vst.msk [vmem:[#allocation6] sm:$0x3] %vm883_vm1, %v1403_v42 }
 0x3ea   :  { %v1405_v46 = vpop.f32.mrf.mxu0 }
 0x3eb   :  { %2013 = shalt.err (!%p2010_p0)
}
 0x3ec   :  { %1438 = dma.vmem_to_hbm [thread:$0]  %s1436_s5, 32, %s2817_s9, [#allocation5]   ;;  %v1874_v51 = vpop.f32.mrf.mxu0 }
 0x3ed   :  { %2022 = dma.done.wait [#allocation3], 32  }
 0x3ee   :  { %2023 = vsyncadd [#allocation3], 4294967264 }
 0x3ef   :  { %2024 = dma.done.wait [#allocation5], 64  }
 0x3f0   :  { %2025 = vsyncadd [#allocation5], 4294967232 }
 0x3f1   :  { %1448 = vsyncpa [#allocation3], 1 }
 0x3f2   :  { %1449 = vsyncpa [#allocation5], 1 }

</bundles_post_ra>
